<compile_context>
chip_gen: v7x
topology: tpu7x:2x2x1
jax: 0.10.0
libtpu: 0.0.40
codegen_flags: <defaults>
</compile_context>

<pallas_src>
import math

import jax
import jax.numpy as jnp
from jax.experimental import pallas as pl
from jax.experimental.pallas import tpu as pltpu


def _round_up(x, m):
    return ((x + m - 1) // m) * m


# ----------------------------------------------------------------------------
# Pallas kernel: gc1 -> LeakyReLU -> gc2 -> l2norm (adjacency pre-normalised)
# ----------------------------------------------------------------------------
def cgcn_kernel(inp_ref, adjn_ref, w1_ref, w2_ref, out_ref):
    adj_n = adjn_ref[...]                       # (Np, Np) bf16, D @ A^T @ D

    # --- gc1: x1 = adj_n @ (inp @ W1)   (bf16 MXU operands, f32 accumulation)
    s1 = jnp.dot(inp_ref[...], w1_ref[...], preferred_element_type=jnp.float32)
    x1 = jnp.dot(adj_n, s1.astype(jnp.bfloat16),
                 preferred_element_type=jnp.float32)

    # LeakyReLU(negative_slope=0.2), kept in f32 (v5e VPU has no bf16)
    x1 = jnp.where(x1 >= 0, x1, 0.2 * x1)

    # --- gc2: x2 = adj_n @ (x1 @ W2)
    s2 = jnp.dot(x1.astype(jnp.bfloat16), w2_ref[...],
                 preferred_element_type=jnp.float32)
    x2 = jnp.dot(adj_n, s2.astype(jnp.bfloat16),
                 preferred_element_type=jnp.float32)

    # --- l2norm along last dim: single EUP rsqrt per row.
    # torch: x / (sqrt(sum(x^2)) + 1e-12); here eps sits under the sqrt --
    # difference is negligible for non-degenerate rows, zero rows stay zero.
    inv_norm = jax.lax.rsqrt(jnp.sum(x2 * x2, axis=-1, keepdims=True) + 1e-12)
    # Output kept f32 for parity with the torch module; emit bf16 here if the
    # downstream consumer feeds it straight back to the MXU.
    out_ref[...] = x2 * inv_norm


# ----------------------------------------------------------------------------
# One-time constant preprocessing (hoisted out of the per-call path)
# ----------------------------------------------------------------------------
def prepare_cgcn_constants(inp_batched, adj_all, w1, w2, lane_granule=128):
    """Precompute gen_adj + padding + bf16 casts ONCE and cache the result.

    adj_all / w1 / w2 are parameters and the word embeddings are fixed at
    inference, so none of this belongs in the per-call path.
    """
    inp = jnp.asarray(inp_batched)[0].astype(jnp.float32)   # (N, C_in)
    A = jnp.asarray(adj_all, jnp.float32)                   # (N, N)
    w1 = jnp.asarray(w1, jnp.float32)
    w2 = jnp.asarray(w2, jnp.float32)

    N, C = inp.shape
    H = w1.shape[1]
    E = w2.shape[1]

    # gen_adj (ML-GCN): adj = D @ A^T @ D with D = diag(rowsum(A)^-1/2).
    # Computed in f32 BEFORE the bf16 cast so the degree normalisation is
    # exact.  Guard isolated nodes (torch would produce inf/NaN here).
    rowsum = jnp.sum(A, axis=1)
    d = jax.lax.rsqrt(jnp.maximum(rowsum, 1e-12))
    adj_norm = d[:, None] * A.T * d[None, :]

    # Rows -> multiple of 8 (sublanes, do NOT pad to 128: M-dim vmatmul pushes
    # scale with rows); feature dims -> multiple of the lane granule so the
    # output store is lane-dense (unmasked vst). Zero-padding is exact for
    # these linear ops.
    Np = _round_up(N, 8)
    Cp = _round_up(C, lane_granule)
    Hp = _round_up(H, lane_granule)
    Ep = _round_up(E, lane_granule)

    def pad2(x, rows, cols):
        pr, pc = rows - x.shape[0], cols - x.shape[1]
        return jnp.pad(x, ((0, pr), (0, pc))) if (pr or pc) else x

    inp_p = pad2(inp, Np, Cp).astype(jnp.bfloat16)
    adj_p = pad2(adj_norm, Np, Np).astype(jnp.bfloat16)   # halves N^2 HBM bytes
    w1_p = pad2(w1, Cp, Hp).astype(jnp.bfloat16)
    w2_p = pad2(w2, Hp, Ep).astype(jnp.bfloat16)

    consts = tuple(jax.block_until_ready(x)
                   for x in (inp_p, adj_p, w1_p, w2_p))
    return consts, (N, E)


# ----------------------------------------------------------------------------
# Jitted pallas_call on the pre-padded constants
# ----------------------------------------------------------------------------
@jax.jit
def _cgcn_call(inp_p, adj_p, w1_p, w2_p):
    Np, Cp = inp_p.shape
    Hp = w1_p.shape[1]
    Ep = w2_p.shape[1]

    flops = 2 * (Np * Cp * Hp + Np * Np * Hp + Np * Hp * Ep + Np * Np * Ep)
    bytes_in = 2 * (Np * Cp + Np * Np + Cp * Hp + Hp * Ep)   # bf16 inputs
    bytes_out = 4 * Np * Ep                                  # f32 output
    cost = pl.CostEstimate(flops=flops, transcendentals=Np,
                           bytes_accessed=bytes_in + bytes_out)

    # Explicit scoped-VMEM budget: operands + f32 intermediates + headroom,
    # clamped to v7x's 64 MiB physical VMEM (v5e's 16 MiB default scope is
    # too small for the whole-graph-resident layout at larger N).
    interm = 4 * (2 * Np * Hp + 2 * Np * Ep)                 # s1,x1,s2,x2
    vmem_limit = int(min(64 << 20,
                         max(16 << 20, 2 * (bytes_in + bytes_out + interm))))

    vmem = pl.BlockSpec(memory_space=pltpu.MemorySpace.VMEM)
    # Whole graph fits in VMEM at these sizes -> single grid point.
    return pl.pallas_call(
        cgcn_kernel,
        out_shape=jax.ShapeDtypeStruct((Np, Ep), jnp.float32),
        in_specs=[vmem, vmem, vmem, vmem],
        out_specs=vmem,
        cost_estimate=cost,
        compiler_params=pltpu.CompilerParams(vmem_limit_bytes=vmem_limit),
    )(inp_p, adj_p, w1_p, w2_p)


def c_gcn_forward(prepared):
    """C_GCN.forward (conv_mode='whole_graph') on pre-prepared constants.

    Returns the (N, E) l2-normalised concept features.  The result is
    independent of the image/feature batch: compute once and cache.
    """
    (inp_p, adj_p, w1_p, w2_p), (N, E) = prepared
    out = _cgcn_call(inp_p, adj_p, w1_p, w2_p)
    if out.shape != (N, E):
        out = out[:N, :E]
    return out


# ----------------------------------------------------------------------------
# Pure-JAX f32 reference mirroring the torch module exactly
# ----------------------------------------------------------------------------
def c_gcn_reference(inp_batched, adj_all, w1, w2):
    inp = jnp.asarray(inp_batched)[0].astype(jnp.float32)
    A = jnp.asarray(adj_all, jnp.float32)
    d = jnp.power(jnp.sum(A, axis=1), -0.5)
    D = jnp.diag(d)
    adj = jnp.matmul(jnp.matmul(A, D).T, D)
    x = adj @ (inp @ jnp.asarray(w1, jnp.float32))
    x = jnp.where(x >= 0, x, 0.2 * x)
    x = adj @ (x @ jnp.asarray(w2, jnp.float32))
    norm = jnp.sqrt(jnp.sum(x * x, axis=-1, keepdims=True)) + 1e-12
    return x / norm


# ----------------------------------------------------------------------------
# Deterministic parameter / input construction (mirrors module __init__)
# ----------------------------------------------------------------------------
def build_params(key, num_classes, in_channel, embed_size):
    k1, k2, k3 = jax.random.split(key, 3)

    hidden = embed_size // 2

    # GraphConvolution.reset_parameters: uniform(-stdv, stdv), stdv = 1/sqrt(out)
    stdv1 = 1.0 / math.sqrt(hidden)
    w1 = jax.random.uniform(k1, (in_channel, hidden),
                            minval=-stdv1, maxval=stdv1, dtype=jnp.float32)
    stdv2 = 1.0 / math.sqrt(embed_size)
    w2 = jax.random.uniform(k2, (hidden, embed_size),
                            minval=-stdv2, maxval=stdv2, dtype=jnp.float32)

    # Synthetic adjacency parameter: non-negative, symmetric, positive row sums.
    # TODO(synk): gen_A_concept (adjacency built from a stats/adj_file) has no
    # in-script equivalent; adj_all is synthesized deterministically here.
    a = jax.random.uniform(k3, (num_classes, num_classes), dtype=jnp.float32)
    adj_all = 0.5 * (a + a.T) + jnp.eye(num_classes, dtype=jnp.float32)

    return w1, w2, adj_all


if __name__ == "__main__":
    num_classes = 16     # graph nodes
    in_channel = 32      # word-embedding dim (module default 300, small here)
    embed_size = 128     # opt.embed_size (multiple of 128 -> lane-dense output)
    batch = 2

    key = jax.random.PRNGKey(0)
    kp, ki, kf = jax.random.split(key, 3)

    w1, w2, adj_all = build_params(kp, num_classes, in_channel, embed_size)

    # inp: (B, num_classes, in_channel); forward uses inp[0]
    inp = jax.random.normal(ki, (batch, num_classes, in_channel),
                            dtype=jnp.float32)
    # `feature` is unused by C_GCN.forward (kept only for interface fidelity)
    feature = jax.random.normal(kf, (batch, embed_size), dtype=jnp.float32)

    # One-time constant preprocessing (gen_adj + padding + bf16 casts), then a
    # single kernel launch.  At inference the output is image-independent:
    # cache `out` and reuse it across the whole batch loop.
    prepared = prepare_cgcn_constants(inp, adj_all, w1, w2)
    out = c_gcn_forward(prepared)
    out = jax.block_until_ready(out)

    assert out.shape == (num_classes, embed_size), out.shape

    # rows should be (near) unit-norm after l2norm
    row_norms = jnp.sqrt(jnp.sum(out * out, axis=-1))
    assert bool(jnp.all(jnp.abs(row_norms - 1.0) < 5e-3)), row_norms

    # matches the f32 torch-style reference (bf16 matmul operands)
    ref = c_gcn_reference(inp, adj_all, w1, w2)
    max_err = float(jnp.max(jnp.abs(out - ref)))
    assert max_err < 2e-2, max_err

    print("KERNEL_OK")
</pallas_src>

<mosaic_0001>
module attributes {stable_mosaic.version = 11 : i64} {
  func.func @cgcn_kernel(%arg0: memref<16x128xbf16, #tpu.memory_space<vmem>>, %arg1: memref<16x16xbf16, #tpu.memory_space<vmem>>, %arg2: memref<128x128xbf16, #tpu.memory_space<vmem>>, %arg3: memref<128x128xbf16, #tpu.memory_space<vmem>>, %arg4: memref<16x128xf32, #tpu.memory_space<vmem>>) attributes {dimension_semantics = [], scalar_prefetch = 0 : i64, scratch_operands = 0 : i64, tpu.core_type = #tpu.core_type<tc>} {
    %c0 = arith.constant 0 : index
    %c0_0 = arith.constant 0 : index
    %0 = vector.load %arg1[%c0, %c0_0] : memref<16x16xbf16, #tpu.memory_space<vmem>>, vector<16x16xbf16>
    %c0_1 = arith.constant 0 : index
    %c0_2 = arith.constant 0 : index
    %1 = vector.load %arg0[%c0_1, %c0_2] : memref<16x128xbf16, #tpu.memory_space<vmem>>, vector<16x128xbf16>
    %c0_3 = arith.constant 0 : index
    %c0_4 = arith.constant 0 : index
    %2 = vector.load %arg2[%c0_3, %c0_4] : memref<128x128xbf16, #tpu.memory_space<vmem>>, vector<128x128xbf16>
    %cst = arith.constant dense<0.000000e+00> : vector<16x128xf32>
    %3 = tpu.matmul %1, %2, %cst {dimension_numbers = #tpu.dot_dimension_numbers<[1], [0], [0], [1], [0, 0, 1, 1], [], []>} : vector<16x128xbf16>, vector<128x128xbf16>, vector<16x128xf32> -> vector<16x128xf32>
    %4 = arith.truncf %3 : vector<16x128xf32> to vector<16x128xbf16>
    %cst_5 = arith.constant dense<0.000000e+00> : vector<16x128xf32>
    %5 = tpu.matmul %0, %4, %cst_5 {dimension_numbers = #tpu.dot_dimension_numbers<[1], [0], [0], [1], [0, 0, 1, 1], [], []>} : vector<16x16xbf16>, vector<16x128xbf16>, vector<16x128xf32> -> vector<16x128xf32>
    %cst_6 = arith.constant 0.000000e+00 : f32
    %6 = vector.broadcast %cst_6 : f32 to vector<16x128xf32>
    %7 = arith.cmpf oge, %5, %6 : vector<16x128xf32>
    %cst_7 = arith.constant 2.000000e-01 : f32
    %8 = vector.broadcast %cst_7 : f32 to vector<16x128xf32>
    %9 = arith.mulf %8, %5 : vector<16x128xf32>
    %10 = arith.select %7, %5, %9 : vector<16x128xi1>, vector<16x128xf32>
    %11 = arith.truncf %10 : vector<16x128xf32> to vector<16x128xbf16>
    %c0_8 = arith.constant 0 : index
    %c0_9 = arith.constant 0 : index
    %12 = vector.load %arg3[%c0_8, %c0_9] : memref<128x128xbf16, #tpu.memory_space<vmem>>, vector<128x128xbf16>
    %cst_10 = arith.constant dense<0.000000e+00> : vector<16x128xf32>
    %13 = tpu.matmul %11, %12, %cst_10 {dimension_numbers = #tpu.dot_dimension_numbers<[1], [0], [0], [1], [0, 0, 1, 1], [], []>} : vector<16x128xbf16>, vector<128x128xbf16>, vector<16x128xf32> -> vector<16x128xf32>
    %14 = arith.truncf %13 : vector<16x128xf32> to vector<16x128xbf16>
    %cst_11 = arith.constant dense<0.000000e+00> : vector<16x128xf32>
    %15 = tpu.matmul %0, %14, %cst_11 {dimension_numbers = #tpu.dot_dimension_numbers<[1], [0], [0], [1], [0, 0, 1, 1], [], []>} : vector<16x16xbf16>, vector<16x128xbf16>, vector<16x128xf32> -> vector<16x128xf32>
    %16 = arith.mulf %15, %15 : vector<16x128xf32>
    %cst_12 = arith.constant dense<0.000000e+00> : vector<16xf32>
    %17 = vector.multi_reduction <add>, %16, %cst_12 [1] : vector<16x128xf32> to vector<16xf32>
    %18 = vector.shape_cast %17 : vector<16xf32> to vector<16x1xf32>
    %cst_13 = arith.constant 9.99999996E-13 : f32
    %19 = vector.broadcast %cst_13 : f32 to vector<16x1xf32>
    %20 = arith.addf %18, %19 : vector<16x1xf32>
    %21 = math.rsqrt %20 : vector<16x1xf32>
    %22 = vector.broadcast %21 : vector<16x1xf32> to vector<16x128xf32>
    %23 = arith.mulf %15, %22 : vector<16x128xf32>
    %c0_14 = arith.constant 0 : index
    %c0_15 = arith.constant 0 : index
    %24 = vector.load %arg4[%c0_14, %c0_15] : memref<16x128xf32, #tpu.memory_space<vmem>>, vector<16x128xf32>
    tpu.vector_store %arg4[%c0_14, %c0_15], %23 {strides = array<i32>} : memref<16x128xf32, #tpu.memory_space<vmem>>, vector<16x128xf32>,
    return
  }
}

</mosaic_0001>

<bundles_post_ra>
// kernel: _cgcn_call.1
= control target key start
LH: loop header
LB: loop body
LE: loop exit
PB: predicated region body
PF: predicated region fallthrough
CT: control target
= control target key end

     0   :  { %9 = vsyncpa [#allocation3], 0  ;;  %s822_s0 = inlined_call_operand.hbm [shape: bf16[16,128], index: 0, kind: input, shape index: {}]   ;;  %s823_s1 = inlined_call_operand.hbm [shape: bf16[16,16], index: 1, kind: input, shape index: {}]   ;;  %s824_s2 = inlined_call_operand.hbm [shape: bf16[128,128], index: 2, kind: input, shape index: {}]   ;;  %s825_s3 = inlined_call_operand.hbm [shape: bf16[128,128], index: 3, kind: input, shape index: {}]   ;;  %s826_s4 = inlined_call_operand.hbm [shape: f32[16,128], index: 4, kind: output, shape index: {}]  }
   0x1   :  { %10 = vsyncpa [#allocation6], 0 }
   0x2   :  { %11 = vsyncpa [#allocation9], 0 }
   0x3   :  { %12 = vsyncpa [#allocation4], 0  ;;  %s672_s15 = smov [#allocation5]   ;;  %s673_s17 = smov [#allocation2]  }
   0x4   :  { %s30_s16 = sshll.u32 %s672_s15, 4  ;;  %s18_s18 = sshll.u32 %s673_s17, 4  ;;  %s31_s16 = int_to_ptr.vmem [resolvable:$true] %s30_s16  ;;  %s708_s18 = int_to_ptr.vmem [resolvable:$true] %s18_s18 }
   0x5   :  { %s554_s21 = scalar_lea.hbm %s823_s1, 128 }
   0x6   :  { %p555_p0 = scmp.ne.s32.totalorder %s823_s1, %s554_s21  ;;  %p558_p1 = scmp.lt.u32.totalorder %s554_s21, %s823_s1 }
   0x8   :  { %p560_p2 = pnand %p558_p1, %p555_p0 }
   0xa   :  { %563 = shalt.err (!%p560_p2)
}
   0xb   :  { %s564_s26 = scalar_lea.vmem %s31_s16, 128  ;;  %p569_p4 = scmp.lt.s32.totalorder %s31_s16, %s31_s16 }
   0xc   :  { %p565_p3 = scmp.ne.s32.totalorder %s31_s16, %s564_s26  ;;  %p570_p5 = scmp.lt.s32.totalorder %s564_s26, %s564_s26 }
   0xe   :  { %p571_p6 = por %p570_p5, %p569_p4 }
  0x10   :  { %p572_p7 = pnand %p571_p6, %p565_p3 }
  0x12   :  { %575 = shalt.err (!%p572_p7)
}
  0x13   :  { %s674_s27 = smov 64   ;;  %s675_s28 = smov 4  }
  0x14   :  { %36 = dma.hbm_to_vmem [thread:$0]  %s823_s1, 128, %s31_s16, [#allocation6], %s674_s27, %s674_s27, %s675_s28  }
  0x15   :  { %s576_s7 = scalar_lea.hbm %s822_s0, 128 }
  0x16   :  { %p577_p8 = scmp.ne.s32.totalorder %s822_s0, %s576_s7  ;;  %p580_p9 = scmp.lt.u32.totalorder %s576_s7, %s822_s0 }
  0x18   :  { %p582_p10 = pnand %p580_p9, %p577_p8 }
  0x1a   :  { %585 = shalt.err (!%p582_p10)
}
  0x1b   :  { %s586_s12 = scalar_lea.vmem %s708_s18, 128  ;;  %p591_p12 = scmp.lt.s32.totalorder %s708_s18, %s708_s18 }
  0x1c   :  { %p587_p11 = scmp.ne.s32.totalorder %s708_s18, %s586_s12  ;;  %p592_p13 = scmp.lt.s32.totalorder %s586_s12, %s586_s12 }
  0x1e   :  { %p593_p0 = por %p592_p13, %p591_p12 }
  0x20   :  { %p594_p1 = pnand %p593_p0, %p587_p11 }
  0x22   :  { %597 = shalt.err (!%p594_p1)
}
  0x23   :  { %24 = dma.hbm_to_vmem [thread:$0]  %s822_s0, 128, %s708_s18, [#allocation3], %s674_s27, %s674_s27, %s675_s28  }
  0x24   :  { %s676_s14 = smov [#allocation7]   ;;  %s677_s16 = smov [#allocation8]  }
  0x25   :  { %s42_s15 = sshll.u32 %s676_s14, 4  ;;  %s54_s17 = sshll.u32 %s677_s16, 4  ;;  %s43_s15 = int_to_ptr.vmem [resolvable:$true] %s42_s15  ;;  %s745_s17 = int_to_ptr.vmem [resolvable:$true] %s54_s17 }
  0x26   :  { %s598_s21 = scalar_lea.hbm %s824_s2, 1024 }
  0x27   :  { %p599_p2 = scmp.ne.s32.totalorder %s824_s2, %s598_s21  ;;  %p602_p3 = scmp.lt.u32.totalorder %s598_s21, %s824_s2 }
  0x29   :  { %p604_p4 = pnand %p602_p3, %p599_p2 }
  0x2b   :  { %607 = shalt.err (!%p604_p4)
}
  0x2c   :  { %s608_s0 = scalar_lea.vmem %s43_s15, 1024  ;;  %p613_p6 = scmp.lt.s32.totalorder %s43_s15, %s43_s15 }
  0x2d   :  { %p609_p5 = scmp.ne.s32.totalorder %s43_s15, %s608_s0  ;;  %p614_p7 = scmp.lt.s32.totalorder %s608_s0, %s608_s0 }
  0x2f   :  { %p615_p8 = por %p614_p7, %p613_p6 }
  0x31   :  { %p616_p9 = pnand %p615_p8, %p609_p5 }
  0x33   :  { %619 = shalt.err (!%p616_p9)
}
  0x34   :  { %48 = dma.hbm_to_vmem [thread:$0]  %s824_s2, 1024, %s43_s15, [#allocation6], %s674_s27, %s674_s27, %s675_s28  }
  0x35   :  { %s620_s5 = scalar_lea.hbm %s825_s3, 1024 }
  0x36   :  { %p621_p10 = scmp.ne.s32.totalorder %s825_s3, %s620_s5  ;;  %p624_p11 = scmp.lt.u32.totalorder %s620_s5, %s825_s3 }
  0x38   :  { %p626_p12 = pnand %p624_p11, %p621_p10 }
  0x3a   :  { %629 = shalt.err (!%p626_p12)
}
  0x3b   :  { %s630_s10 = scalar_lea.vmem %s745_s17, 1024  ;;  %p635_p0 = scmp.lt.s32.totalorder %s745_s17, %s745_s17 }
  0x3c   :  { %p631_p13 = scmp.ne.s32.totalorder %s745_s17, %s630_s10  ;;  %p636_p1 = scmp.lt.s32.totalorder %s630_s10, %s630_s10 }
  0x3e   :  { %p637_p2 = por %p636_p1, %p635_p0 }
  0x40   :  { %p638_p3 = pnand %p637_p2, %p631_p13 }
  0x42   :  { %641 = shalt.err (!%p638_p3)
}
  0x43   :  { %60 = dma.hbm_to_vmem [thread:$0]  %s825_s3, 1024, %s745_s17, [#allocation9], %s674_s27, %s674_s27, %s675_s28  }
  0x44   :  { %664 = dma.done.wait [#allocation3], 128  }
  0x45   :  { %665 = vsyncadd [#allocation3], 4294967168 }
  0x46   :  { %666 = dma.done.wait [#allocation6], 1152  }
  0x47   :  { %667 = vsyncadd [#allocation6], 4294966144 }
  0x48   :  { %668 = dma.done.wait [#allocation9], 1024  }
  0x49   :  { %669 = vsyncadd [#allocation9], 4294966272  ;;  %v678_v0 = vmov 0.0   ;;  %vm679_vm0 = vmmov 0   ;;  %v532_v1 = vld [vmem:[#allocation7] sm:$0xff]   ;;  %v533_v2 = vld [vmem:[#allocation7 + $0x8] sm:$0xff]  }
  0x4a   :  { %469 = vmatprep.subr.bf16.mxu0 %v678_v0  ;;  %485 = vmatprep.mubr.msk.bf16.mxu0 %vm679_vm0, %v678_v0  ;;  %v534_v3 = vld [vmem:[#allocation7 + $0x10] sm:$0xff]   ;;  %v535_v4 = vld [vmem:[#allocation7 + $0x18] sm:$0xff]   ;;  %v536_v5 = vld [vmem:[#allocation7 + $0x20] sm:$0xff]   ;;  %vm195_vm1 = vcmask 130048   ;;  %s680_s3 = smov [#allocation10]  }
  0x4b   :  { %489 = vmatprep.subr.bf16.mxu1 %v678_v0  ;;  %491 = vmatprep.mubr.msk.bf16.mxu1 %vm679_vm0, %v678_v0  ;;  %v537_v6 = vld [vmem:[#allocation7 + $0x28] sm:$0xff]   ;;  %v538_v7 = vld [vmem:[#allocation7 + $0x30] sm:$0xff]   ;;  %v539_v8 = vld [vmem:[#allocation7 + $0x38] sm:$0xff]   ;;  %s413_s27 = sshll.u32 %s680_s3, 4  ;;  %s414_s27 = int_to_ptr.vmem [resolvable:$true] %s413_s27 }
  0x4c   :  { %470 = vmatpush3.bf16.msra.mxu0 %v532_v1  ;;  %v540_v9 = vld [vmem:[#allocation2] sm:$0xff]   ;;  %v541_v15 = vld [vmem:[#allocation5] sm:$0xff]   ;;  %v542_v16 = vld [vmem:[#allocation8] sm:$0xff]   ;;  %s642_s28 = scalar_lea.vmem %s414_s27, 256  ;;  %p647_p5 = scmp.lt.s32.totalorder %s414_s27, %s414_s27 }
  0x4d   :  { %471 = vmatprep.subr.bf16.mxu0 %v678_v0  ;;  %v543_v17 = vld [vmem:[#allocation8 + $0x8] sm:$0xff]   ;;  %v544_v18 = vld [vmem:[#allocation8 + $0x10] sm:$0xff]   ;;  %v545_v19 = vld [vmem:[#allocation8 + $0x18] sm:$0xff]   ;;  %p643_p4 = scmp.ne.s32.totalorder %s414_s27, %s642_s28  ;;  %p648_p6 = scmp.lt.s32.totalorder %s642_s28, %s642_s28 }
  0x4e   :  { %v546_v20 = vld [vmem:[#allocation8 + $0x20] sm:$0xff]   ;;  %v547_v21 = vld [vmem:[#allocation8 + $0x28] sm:$0xff]   ;;  %v548_v22 = vld [vmem:[#allocation8 + $0x30] sm:$0xff]  }
  0x4f   :  { %v549_v23 = vld [vmem:[#allocation8 + $0x38] sm:$0xff]   ;;  %p649_p7 = por %p648_p6, %p647_p5 }
  0x50   :  { %472 = vmatpush3.bf16.msra.mxu0 %v533_v2 }
  0x51   :  { %473 = vmatprep.subr.bf16.mxu0 %v678_v0  ;;  %p650_p8 = pnand %p649_p7, %p643_p4 }
  0x54   :  { %474 = vmatpush3.bf16.msra.mxu0 %v534_v3 }
  0x55   :  { %475 = vmatprep.subr.bf16.mxu0 %v678_v0 }
  0x58   :  { %476 = vmatpush3.bf16.msra.mxu0 %v535_v4 }
  0x59   :  { %477 = vmatprep.subr.bf16.mxu0 %v678_v0 }
  0x5c   :  { %478 = vmatpush3.bf16.msra.mxu0 %v536_v5 }
  0x5d   :  { %479 = vmatprep.subr.bf16.mxu0 %v678_v0 }
  0x60   :  { %480 = vmatpush3.bf16.msra.mxu0 %v537_v6 }
  0x61   :  { %481 = vmatprep.subr.bf16.mxu0 %v678_v0 }
  0x64   :  { %482 = vmatpush3.bf16.msra.mxu0 %v538_v7 }
  0x65   :  { %483 = vmatprep.subr.bf16.mxu0 %v678_v0 }
  0x68   :  { %484 = vmatpush3.bf16.msra.mxu0 %v539_v8 }
  0x69   :  { %515 = vmatprep.subr.bf16.mxu0 %v678_v0 }
  0x6b   :  { %486 = vmatmul.mubr.bf16.vlgmr.msra.gmra.mrb[0].mxu0 %v540_v9 }
  0x6c   :  { %517 = vmatprep.mubr.msk.bf16.mxu0 %vm679_vm0, %v678_v0 }
 0x13e   :  { %v182_v10 = vpop.f32.mrb[0].mxu0 }
 0x13f   :  { %v487_v11 = vpop.f32.mrb[1].mxu0 }
 0x140   :  { %v185_v12 = vpop.f32.mrb[2].mxu0 }
 0x141   :  { %v189_v13 = vpack.c.bf16 %v185_v12, %v182_v10  ;;  %v488_v14 = vpop.f32.mrb[3].mxu0 }
 0x143   :  { %490 = vmatpush3.bf16.msra.mxu1 %v189_v13 }
 0x144   :  { %495 = vmatprep.subr.bf16.mxu1 %v678_v0 }
 0x146   :  { %492 = vmatmul.mubr.msk.bf16.vlgmr.msra.gmra.mrb[0].mxu1 %vm195_vm1, %v541_v15 }
 0x147   :  { %496 = vmatpush3.bf16.msra.mxu1 %v542_v16  ;;  %511 = vmatprep.mubr.msk.bf16.mxu1 %vm679_vm0, %v678_v0 }
 0x148   :  { %497 = vmatprep.subr.bf16.mxu1 %v678_v0 }
 0x14b   :  { %498 = vmatpush3.bf16.msra.mxu1 %v543_v17 }
 0x14c   :  { %499 = vmatprep.subr.bf16.mxu1 %v678_v0 }
 0x14f   :  { %500 = vmatpush3.bf16.msra.mxu1 %v544_v18 }
 0x150   :  { %501 = vmatprep.subr.bf16.mxu1 %v678_v0 }
 0x153   :  { %502 = vmatpush3.bf16.msra.mxu1 %v545_v19 }
 0x154   :  { %503 = vmatprep.subr.bf16.mxu1 %v678_v0 }
 0x157   :  { %504 = vmatpush3.bf16.msra.mxu1 %v546_v20 }
 0x158   :  { %505 = vmatprep.subr.bf16.mxu1 %v678_v0 }
 0x15b   :  { %506 = vmatpush3.bf16.msra.mxu1 %v547_v21 }
 0x15c   :  { %507 = vmatprep.subr.bf16.mxu1 %v678_v0 }
 0x15f   :  { %508 = vmatpush3.bf16.msra.mxu1 %v548_v22 }
 0x160   :  { %509 = vmatprep.subr.bf16.mxu1 %v678_v0 }
 0x163   :  { %510 = vmatpush3.bf16.msra.mxu1 %v549_v23 }
 0x219   :  { %v233_v24 = vpop.f32.mrb[0].mxu1 }
 0x21a   :  { %v242_v25 = vmul.f32 0.2, %v233_v24  ;;  %v493_v26 = vpop.f32.mrb[1].mxu1  ;;  %vm240_vm2 = vcmp.ge.f32.partialorder %v233_v24, 0.0 }
 0x21b   :  { %v236_v27 = vpop.f32.mrb[2].mxu1 }
 0x21c   :  { %vm241_vm3 = vcmp.ge.f32.partialorder %v236_v27, 0.0  ;;  %v243_v28 = vmul.f32 0.2, %v236_v27  ;;  %v494_v29 = vpop.f32.mrb[3].mxu1  ;;  %v244_v30 = vsel %vm240_vm2, %v233_v24, %v242_v25 }
 0x21e   :  { %v245_v31 = vsel %vm241_vm3, %v236_v27, %v243_v28 }
 0x21f   :  { %v246_v32 = vpack.c.bf16 %v245_v31, %v244_v30 }
 0x221   :  { %512 = vmatmul.mubr.bf16.vlgmr.msra.gmra.mrb[4].mxu1 %v246_v32 }
 0x2f4   :  { %v345_v33 = vpop.f32.mrb[4].mxu1 }
 0x2f5   :  { %v513_v34 = vpop.f32.mrb[5].mxu1 }
 0x2f6   :  { %v348_v35 = vpop.f32.mrb[6].mxu1 }
 0x2f7   :  { %v352_v36 = vpack.c.bf16 %v348_v35, %v345_v33  ;;  %v514_v37 = vpop.f32.mrb[7].mxu1 }
 0x2f9   :  { %516 = vmatpush3.bf16.msra.mxu0 %v352_v36 }
 0x2fc   :  { %518 = vmatmul.mubr.msk.bf16.vlgmr.msra.gmra.mrb[4].mxu0 %vm195_vm1, %v541_v15 }
 0x3cf   :  { %v387_v38 = vpop.f32.mrb[4].mxu0 }
 0x3d0   :  { %v394_v39 = vmul.f32 %v387_v38, %v387_v38  ;;  %v519_v40 = vpop.f32.mrb[5].mxu0 }
 0x3d1   :  { %v390_v41 = vpop.f32.mrb[6].mxu0 }
 0x3d2   :  { %396 = vadd.xlane.f32.xlu0 %v394_v39  ;;  %v520_v42 = vpop.f32.mrb[7].mxu0  ;;  %v395_v43 = vmul.f32 %v390_v41, %v390_v41 }
 0x3d6   :  { %398 = vadd.xlane.f32.xlu0 %v395_v43 }
 0x45f   :  { %v397_v44 = vpop.xlane.xlu0 %396 }
 0x460   :  { %v400_v45 = vadd.f32 1e-12, %v397_v44 }
 0x462   :  { %550 = vrsqrt.f32 %v400_v45 }
 0x463   :  { %v399_v46 = vpop.xlane.xlu0 %398 }
 0x464   :  { %v401_v47 = vadd.f32 1e-12, %v399_v46 }
 0x466   :  { %552 = vrsqrt.f32 %v401_v47 }
 0x46c   :  { %v551_v48 = vpop.eup %550 }
 0x46d   :  { %v404_v49 = vmul.f32 %v551_v48, %v387_v38 }
 0x46f   :  { %406 = vst [vmem:[#allocation10] sm:$0xff] %v404_v49 }
 0x470   :  { %v553_v50 = vpop.eup %552 }
 0x471   :  { %v405_v51 = vmul.f32 %v553_v50, %v390_v41 }
 0x473   :  { %407 = vst [vmem:[#allocation10 + $0x8] sm:$0xff] %v405_v51 }
 0x474   :  { %653 = shalt.err (!%p650_p8)
}
 0x475   :  { %s654_s13 = scalar_lea.hbm %s826_s4, 256 }
 0x476   :  { %p655_p9 = scmp.ne.s32.totalorder %s826_s4, %s654_s13  ;;  %p658_p10 = scmp.lt.u32.totalorder %s654_s13, %s826_s4 }
 0x478   :  { %p660_p11 = pnand %p658_p10, %p655_p9 }
 0x47a   :  { %663 = shalt.err (!%p660_p11)
}
 0x47b   :  { %s681_s19 = smov 128   ;;  %s682_s20 = smov 8  }
 0x47c   :  { %419 = dma.vmem_to_hbm [thread:$0]  %s414_s27, 256, %s826_s4, [#allocation4], %s681_s19, %s681_s19, %s682_s20  }
 0x47d   :  { %670 = dma.done.wait [#allocation4], 256  }
 0x47e   :  { %671 = vsyncadd [#allocation4], 4294967040 }
 0x47f   :  { %423 = vsyncpa [#allocation3], 1 }
 0x480   :  { %424 = vsyncpa [#allocation6], 1 }
 0x481   :  { %425 = vsyncpa [#allocation9], 1 }
 0x482   :  { %426 = vsyncpa [#allocation4], 1 }

</bundles_post_ra>
